<compile_context>
chip_gen: v7x
topology: tpu7x:2x2x1
jax: 0.10.0
libtpu: 0.0.40
codegen_flags: <defaults>
</compile_context>

<pallas_src>
import functools

import jax
import jax.numpy as jnp
from jax.experimental import pallas as pl
from jax.experimental.pallas import tpu as pltpu


def _round_up(x, m):
    return ((x + m - 1) // m) * m


def _rbm_fused_kernel(v_ref, wt_ref, w_ref, hb_ref, vb_ref, u_ref, g_ref,
                      o_ref, *, sigma, iters):
    wt = wt_ref[...]                       # (Vp, Hp) bf16, resident across grid
    w = w_ref[...]                         # (Hp, Vp) bf16, resident across grid
    hb = hb_ref[...]                       # (1, Hp)  f32
    vb = vb_ref[...]                       # (1, Vp)  f32
    v = v_ref[...].astype(jnp.bfloat16)    # (TB, Vp) loop-carried in bf16

    # Statically unrolled refinement loop (iters is a small compile-time const).
    # TODO(synk): switch to lax.fori_loop for iters > ~4 to bound vreg pressure.
    for t in range(iters):
        # p(h|v) = sigmoid(v @ W.T + h_bias); Bernoulli sample via u < p,
        # rewritten divide-free:  u < 1/(1+e)  <=>  u*(1+e) < 1,  e = exp(-l).
        logits_h = jnp.dot(v, wt, preferred_element_type=jnp.float32) + hb
        e = jnp.exp(-logits_h)
        u = u_ref[t]                                        # (TB, Hp) f32
        h = jnp.where(u * (1.0 + e) < 1.0, 1.0, 0.0).astype(jnp.bfloat16)

        # mean(v|h) = h @ W + v_bias ;  v = tanh(mean + sigma * N(0,1))
        mean_v = jnp.dot(h, w, preferred_element_type=jnp.float32) + vb
        v = jnp.tanh(mean_v + sigma * g_ref[t]).astype(jnp.bfloat16)

    o_ref[...] = v.astype(o_ref.dtype)


def rbm_forward(v, W, h_bias, v_bias, sigma, seed=0, iters=1):
    """GaussianBinaryRBM.forward(v, iter=iters) — all iterations in one kernel."""
    iters = int(iters)
    if iters <= 0:
        return v

    B, V = v.shape
    H = W.shape[0]

    # Lane-dense padding (multiples of 128).
    Vp = _round_up(V, 128)
    Hp = _round_up(H, 128)

    # Batch tile: keep >= 2 grid steps when the batch allows it so the
    # ("parallel",) axis actually splits across both v7x TensorCores.
    B8 = _round_up(B, 8)
    if B8 >= 16:
        TB = min(256, _round_up((B8 + 1) // 2, 8))
    else:
        TB = B8
    Bp = _round_up(B, TB)
    grid = (Bp // TB,)

    # Zero padding keeps padded hidden/visible units inert (they only multiply
    # zero rows/cols of W); padded batch rows are sliced off afterward.
    v_p = jnp.zeros((Bp, Vp), jnp.float32).at[:B, :V].set(v.astype(jnp.float32))
    w_p = jnp.zeros((Hp, Vp), jnp.bfloat16).at[:H, :V].set(W.astype(jnp.bfloat16))
    wt_p = jnp.zeros((Vp, Hp), jnp.bfloat16).at[:V, :H].set(W.T.astype(jnp.bfloat16))
    hb_p = jnp.zeros((1, Hp), jnp.float32).at[0, :H].set(h_bias.astype(jnp.float32))
    vb_p = jnp.zeros((1, Vp), jnp.float32).at[0, :V].set(v_bias.astype(jnp.float32))

    # Host-side noise (portable; see TODO about in-kernel PRNG on pure TPU).
    k_u, k_g = jax.random.split(jax.random.PRNGKey(int(seed)))
    u_noise = jax.random.uniform(k_u, (iters, Bp, Hp), dtype=jnp.float32)
    g_noise = jax.random.normal(k_g, (iters, Bp, Vp), dtype=jnp.float32)

    kernel = functools.partial(_rbm_fused_kernel, sigma=float(sigma), iters=iters)

    # Advisory cost estimate + explicit VMEM budget.
    flops = 4 * Bp * Hp * Vp * iters                      # two matmuls / iter
    transcendentals = Bp * (Hp + Vp) * iters              # exp + tanh
    bytes_accessed = (v_p.size * 4 + (w_p.size + wt_p.size) * 2 + hb_p.size * 4
                      + vb_p.size * 4 + u_noise.size * 4 + g_noise.size * 4
                      + Bp * Vp * 4)

    vmem_bytes = (2 * (w_p.size + wt_p.size) * 2          # W + W.T (dbl-buffered, bf16)
                  + 2 * 2 * TB * Vp * 4                   # v tile + out tile (dbl-buf)
                  + 2 * iters * TB * (Hp + Vp) * 4        # noise tiles (dbl-buf)
                  + 4 * (Hp + Vp)                         # biases
                  + 4 * TB * (Hp + Vp) * 4)               # f32 intermediates headroom
    vmem_limit = max(32 << 20, min(int(vmem_bytes * 3 // 2), 64 << 20))

    out = pl.pallas_call(
        kernel,
        out_shape=jax.ShapeDtypeStruct((Bp, Vp), jnp.float32),
        grid=grid,
        in_specs=[
            pl.BlockSpec((TB, Vp), lambda i: (i, 0)),            # v   (batch-tiled)
            pl.BlockSpec((Vp, Hp), lambda i: (0, 0)),            # W.T (resident)
            pl.BlockSpec((Hp, Vp), lambda i: (0, 0)),            # W   (resident)
            pl.BlockSpec((1, Hp), lambda i: (0, 0)),             # h_bias
            pl.BlockSpec((1, Vp), lambda i: (0, 0)),             # v_bias
            pl.BlockSpec((iters, TB, Hp), lambda i: (0, i, 0)),  # uniforms
            pl.BlockSpec((iters, TB, Vp), lambda i: (0, i, 0)),  # gaussians
        ],
        out_specs=pl.BlockSpec((TB, Vp), lambda i: (i, 0)),
        compiler_params=pltpu.CompilerParams(
            dimension_semantics=("parallel",),
            vmem_limit_bytes=vmem_limit),
        cost_estimate=pl.CostEstimate(flops=flops,
                                      transcendentals=transcendentals,
                                      bytes_accessed=bytes_accessed),
    )(v_p, wt_p, w_p, hb_p, vb_p, u_noise, g_noise)

    return out[:B, :V]


if __name__ == "__main__":
    # Small shapes consistent with the module: a batch of visible vectors.
    batch = 8
    visible_dim = 64
    hidden_dim = 32
    sigma = 0.1
    iters = 2

    key = jax.random.PRNGKey(0)
    k_w, k_v = jax.random.split(key)

    # Parameter init mirroring __init__: W ~ 0.01*randn(H, V); biases zero.
    W = 0.01 * jax.random.normal(k_w, (hidden_dim, visible_dim), dtype=jnp.float32)
    v_bias = jnp.zeros((visible_dim,), dtype=jnp.float32)
    h_bias = jnp.zeros((hidden_dim,), dtype=jnp.float32)

    v0 = jax.random.normal(k_v, (batch, visible_dim), dtype=jnp.float32)

    out = rbm_forward(v0, W, h_bias, v_bias, sigma, seed=0, iters=iters)
    jax.block_until_ready(out)

    assert out.shape == (batch, visible_dim)
    assert out.dtype == jnp.float32
    assert bool(jnp.all(jnp.isfinite(out)))
    assert bool(jnp.all(jnp.abs(out) <= 1.0))   # tanh output range
    print("KERNEL_OK")
</pallas_src>

<mosaic_0001>
module attributes {stable_mosaic.version = 11 : i64} {
  func.func @_rbm_fused_kernel(%arg0: i32, %arg1: memref<8x128xf32, #tpu.memory_space<vmem>>, %arg2: memref<128x128xbf16, #tpu.memory_space<vmem>>, %arg3: memref<128x128xbf16, #tpu.memory_space<vmem>>, %arg4: memref<1x128xf32, #tpu.memory_space<vmem>>, %arg5: memref<1x128xf32, #tpu.memory_space<vmem>>, %arg6: memref<2x8x128xf32, #tpu.memory_space<vmem>>, %arg7: memref<2x8x128xf32, #tpu.memory_space<vmem>>, %arg8: memref<8x128xf32, #tpu.memory_space<vmem>>) attributes {dimension_semantics = [#tpu.dimension_semantics<parallel>], iteration_bounds = array<i64: 1>, scalar_prefetch = 0 : i64, scratch_operands = 0 : i64, tpu.core_type = #tpu.core_type<tc>, window_params = [{transform_indices = @transform_0, window_bounds = array<i64: 8, 128>}, {pipeline_mode = #tpu.pipeline_mode<synchronous>, transform_indices = @transform_1, window_bounds = array<i64: 128, 128>}, {pipeline_mode = #tpu.pipeline_mode<synchronous>, transform_indices = @transform_2, window_bounds = array<i64: 128, 128>}, {pipeline_mode = #tpu.pipeline_mode<synchronous>, transform_indices = @transform_3, window_bounds = array<i64: 1, 128>}, {pipeline_mode = #tpu.pipeline_mode<synchronous>, transform_indices = @transform_4, window_bounds = array<i64: 1, 128>}, {transform_indices = @transform_5, window_bounds = array<i64: 2, 8, 128>}, {transform_indices = @transform_6, window_bounds = array<i64: 2, 8, 128>}, {transform_indices = @transform_7, window_bounds = array<i64: 8, 128>}]} {
    %c0 = arith.constant 0 : index
    %c0_0 = arith.constant 0 : index
    %0 = vector.load %arg2[%c0, %c0_0] : memref<128x128xbf16, #tpu.memory_space<vmem>>, vector<128x128xbf16>
    %c0_1 = arith.constant 0 : index
    %c0_2 = arith.constant 0 : index
    %1 = vector.load %arg3[%c0_1, %c0_2] : memref<128x128xbf16, #tpu.memory_space<vmem>>, vector<128x128xbf16>
    %c0_3 = arith.constant 0 : index
    %c0_4 = arith.constant 0 : index
    %2 = vector.load %arg4[%c0_3, %c0_4] : memref<1x128xf32, #tpu.memory_space<vmem>>, vector<1x128xf32>
    %c0_5 = arith.constant 0 : index
    %c0_6 = arith.constant 0 : index
    %3 = vector.load %arg5[%c0_5, %c0_6] : memref<1x128xf32, #tpu.memory_space<vmem>>, vector<1x128xf32>
    %c0_7 = arith.constant 0 : index
    %c0_8 = arith.constant 0 : index
    %4 = vector.load %arg1[%c0_7, %c0_8] : memref<8x128xf32, #tpu.memory_space<vmem>>, vector<8x128xf32>
    %5 = arith.truncf %4 : vector<8x128xf32> to vector<8x128xbf16>
    %cst = arith.constant dense<0.000000e+00> : vector<8x128xf32>
    %6 = tpu.matmul %5, %0, %cst {dimension_numbers = #tpu.dot_dimension_numbers<[1], [0], [0], [1], [0, 0, 1, 1], [], []>} : vector<8x128xbf16>, vector<128x128xbf16>, vector<8x128xf32> -> vector<8x128xf32>
    %7 = vector.broadcast %2 : vector<1x128xf32> to vector<8x128xf32>
    %8 = arith.addf %6, %7 : vector<8x128xf32>
    %cst_9 = arith.constant 0.000000e+00 : f32
    %9 = vector.broadcast %cst_9 : f32 to vector<8x128xf32>
    %10 = arith.subf %9, %8 : vector<8x128xf32>
    %11 = math.exp %10 : vector<8x128xf32>
    %c0_10 = arith.constant 0 : index
    %c0_11 = arith.constant 0 : index
    %c0_12 = arith.constant 0 : index
    %12 = vector.load %arg6[%c0_10, %c0_11, %c0_12] : memref<2x8x128xf32, #tpu.memory_space<vmem>>, vector<1x8x128xf32>
    %13 = vector.shape_cast %12 : vector<1x8x128xf32> to vector<8x128xf32>
    %cst_13 = arith.constant 1.000000e+00 : f32
    %14 = vector.broadcast %cst_13 : f32 to vector<8x128xf32>
    %15 = arith.addf %14, %11 : vector<8x128xf32>
    %16 = arith.mulf %13, %15 : vector<8x128xf32>
    %cst_14 = arith.constant 1.000000e+00 : f32
    %17 = vector.broadcast %cst_14 : f32 to vector<8x128xf32>
    %18 = arith.cmpf olt, %16, %17 : vector<8x128xf32>
    %cst_15 = arith.constant 1.000000e+00 : f32
    %cst_16 = arith.constant 0.000000e+00 : f32
    %19 = vector.broadcast %cst_15 : f32 to vector<8x128xf32>
    %20 = vector.broadcast %cst_16 : f32 to vector<8x128xf32>
    %21 = arith.select %18, %19, %20 : vector<8x128xi1>, vector<8x128xf32>
    %22 = arith.truncf %21 : vector<8x128xf32> to vector<8x128xbf16>
    %cst_17 = arith.constant dense<0.000000e+00> : vector<8x128xf32>
    %23 = tpu.matmul %22, %1, %cst_17 {dimension_numbers = #tpu.dot_dimension_numbers<[1], [0], [0], [1], [0, 0, 1, 1], [], []>} : vector<8x128xbf16>, vector<128x128xbf16>, vector<8x128xf32> -> vector<8x128xf32>
    %24 = vector.broadcast %3 : vector<1x128xf32> to vector<8x128xf32>
    %25 = arith.addf %23, %24 : vector<8x128xf32>
    %c0_18 = arith.constant 0 : index
    %c0_19 = arith.constant 0 : index
    %c0_20 = arith.constant 0 : index
    %26 = vector.load %arg7[%c0_18, %c0_19, %c0_20] : memref<2x8x128xf32, #tpu.memory_space<vmem>>, vector<1x8x128xf32>
    %27 = vector.shape_cast %26 : vector<1x8x128xf32> to vector<8x128xf32>
    %cst_21 = arith.constant 1.000000e-01 : f32
    %28 = vector.broadcast %cst_21 : f32 to vector<8x128xf32>
    %29 = arith.mulf %28, %27 : vector<8x128xf32>
    %30 = arith.addf %25, %29 : vector<8x128xf32>
    %31 = math.tanh %30 : vector<8x128xf32>
    %32 = arith.truncf %31 : vector<8x128xf32> to vector<8x128xbf16>
    %cst_22 = arith.constant dense<0.000000e+00> : vector<8x128xf32>
    %33 = tpu.matmul %32, %0, %cst_22 {dimension_numbers = #tpu.dot_dimension_numbers<[1], [0], [0], [1], [0, 0, 1, 1], [], []>} : vector<8x128xbf16>, vector<128x128xbf16>, vector<8x128xf32> -> vector<8x128xf32>
    %34 = vector.broadcast %2 : vector<1x128xf32> to vector<8x128xf32>
    %35 = arith.addf %33, %34 : vector<8x128xf32>
    %cst_23 = arith.constant 0.000000e+00 : f32
    %36 = vector.broadcast %cst_23 : f32 to vector<8x128xf32>
    %37 = arith.subf %36, %35 : vector<8x128xf32>
    %38 = math.exp %37 : vector<8x128xf32>
    %c1 = arith.constant 1 : index
    %c0_24 = arith.constant 0 : index
    %c0_25 = arith.constant 0 : index
    %39 = vector.load %arg6[%c1, %c0_24, %c0_25] : memref<2x8x128xf32, #tpu.memory_space<vmem>>, vector<1x8x128xf32>
    %40 = vector.shape_cast %39 : vector<1x8x128xf32> to vector<8x128xf32>
    %cst_26 = arith.constant 1.000000e+00 : f32
    %41 = vector.broadcast %cst_26 : f32 to vector<8x128xf32>
    %42 = arith.addf %41, %38 : vector<8x128xf32>
    %43 = arith.mulf %40, %42 : vector<8x128xf32>
    %cst_27 = arith.constant 1.000000e+00 : f32
    %44 = vector.broadcast %cst_27 : f32 to vector<8x128xf32>
    %45 = arith.cmpf olt, %43, %44 : vector<8x128xf32>
    %cst_28 = arith.constant 1.000000e+00 : f32
    %cst_29 = arith.constant 0.000000e+00 : f32
    %46 = vector.broadcast %cst_28 : f32 to vector<8x128xf32>
    %47 = vector.broadcast %cst_29 : f32 to vector<8x128xf32>
    %48 = arith.select %45, %46, %47 : vector<8x128xi1>, vector<8x128xf32>
    %49 = arith.truncf %48 : vector<8x128xf32> to vector<8x128xbf16>
    %cst_30 = arith.constant dense<0.000000e+00> : vector<8x128xf32>
    %50 = tpu.matmul %49, %1, %cst_30 {dimension_numbers = #tpu.dot_dimension_numbers<[1], [0], [0], [1], [0, 0, 1, 1], [], []>} : vector<8x128xbf16>, vector<128x128xbf16>, vector<8x128xf32> -> vector<8x128xf32>
    %51 = vector.broadcast %3 : vector<1x128xf32> to vector<8x128xf32>
    %52 = arith.addf %50, %51 : vector<8x128xf32>
    %c1_31 = arith.constant 1 : index
    %c0_32 = arith.constant 0 : index
    %c0_33 = arith.constant 0 : index
    %53 = vector.load %arg7[%c1_31, %c0_32, %c0_33] : memref<2x8x128xf32, #tpu.memory_space<vmem>>, vector<1x8x128xf32>
    %54 = vector.shape_cast %53 : vector<1x8x128xf32> to vector<8x128xf32>
    %cst_34 = arith.constant 1.000000e-01 : f32
    %55 = vector.broadcast %cst_34 : f32 to vector<8x128xf32>
    %56 = arith.mulf %55, %54 : vector<8x128xf32>
    %57 = arith.addf %52, %56 : vector<8x128xf32>
    %58 = math.tanh %57 : vector<8x128xf32>
    %59 = arith.truncf %58 : vector<8x128xf32> to vector<8x128xbf16>
    %60 = arith.extf %59 : vector<8x128xbf16> to vector<8x128xf32>
    %c0_35 = arith.constant 0 : index
    %c0_36 = arith.constant 0 : index
    %61 = vector.load %arg8[%c0_35, %c0_36] : memref<8x128xf32, #tpu.memory_space<vmem>>, vector<8x128xf32>
    tpu.vector_store %arg8[%c0_35, %c0_36], %60 {strides = array<i32>} : memref<8x128xf32, #tpu.memory_space<vmem>>, vector<8x128xf32>,
    return
  }
  func.func @transform_0(%arg0: i32) -> (i32, i32) {
    %c0_i32 = arith.constant 0 : i32
    %c0_i32_0 = arith.constant 0 : i32
    return %arg0, %c0_i32 : i32, i32
  }
  func.func @transform_1(%arg0: i32) -> (i32, i32) {
    %c0_i32 = arith.constant 0 : i32
    %c0_i32_0 = arith.constant 0 : i32
    %c0_i32_1 = arith.constant 0 : i32
    return %c0_i32, %c0_i32_0 : i32, i32
  }
  func.func @transform_2(%arg0: i32) -> (i32, i32) {
    %c0_i32 = arith.constant 0 : i32
    %c0_i32_0 = arith.constant 0 : i32
    %c0_i32_1 = arith.constant 0 : i32
    return %c0_i32, %c0_i32_0 : i32, i32
  }
  func.func @transform_3(%arg0: i32) -> (i32, i32) {
    %c0_i32 = arith.constant 0 : i32
    %c0_i32_0 = arith.constant 0 : i32
    %c0_i32_1 = arith.constant 0 : i32
    return %c0_i32, %c0_i32_0 : i32, i32
  }
  func.func @transform_4(%arg0: i32) -> (i32, i32) {
    %c0_i32 = arith.constant 0 : i32
    %c0_i32_0 = arith.constant 0 : i32
    %c0_i32_1 = arith.constant 0 : i32
    return %c0_i32, %c0_i32_0 : i32, i32
  }
  func.func @transform_5(%arg0: i32) -> (i32, i32, i32) {
    %c0_i32 = arith.constant 0 : i32
    %c0_i32_0 = arith.constant 0 : i32
    %c0_i32_1 = arith.constant 0 : i32
    return %c0_i32, %arg0, %c0_i32_0 : i32, i32, i32
  }
  func.func @transform_6(%arg0: i32) -> (i32, i32, i32) {
    %c0_i32 = arith.constant 0 : i32
    %c0_i32_0 = arith.constant 0 : i32
    %c0_i32_1 = arith.constant 0 : i32
    return %c0_i32, %arg0, %c0_i32_0 : i32, i32, i32
  }
  func.func @transform_7(%arg0: i32) -> (i32, i32) {
    %c0_i32 = arith.constant 0 : i32
    %c0_i32_0 = arith.constant 0 : i32
    return %arg0, %c0_i32 : i32, i32
  }
}

</mosaic_0001>

<bundles_post_ra>
// kernel: tpu_custom_call.1
= control target key start
LH: loop header
LB: loop body
LE: loop exit
PB: predicated region body
PF: predicated region fallthrough
CT: control target
= control target key end

     0   :  { %12 = vsyncpa [#allocation3], 0  ;;  %s905_s0 = inlined_call_operand.hbm [shape: f32[8,128], index: 0, kind: input, shape index: {}]   ;;  %s906_s1 = inlined_call_operand.hbm [shape: bf16[128,128], index: 1, kind: input, shape index: {}]   ;;  %s907_s2 = inlined_call_operand.hbm [shape: bf16[128,128], index: 2, kind: input, shape index: {}]   ;;  %s908_s3 = inlined_call_operand.vmem [shape: f32[1,128], index: 3, kind: input, shape index: {}]   ;;  %s909_s4 = inlined_call_operand.vmem [shape: f32[1,128], index: 4, kind: input, shape index: {}]   ;;  %s910_s5 = inlined_call_operand.vmem [shape: f32[2,8,128], index: 5, kind: input, shape index: {}]   ;;  %s911_s6 = inlined_call_operand.hbm [shape: f32[2,8,128], index: 6, kind: input, shape index: {}]   ;;  %s912_s7 = inlined_call_operand.hbm [shape: f32[8,128], index: 7, kind: output, shape index: {}]  }
   0x1   :  { %13 = vsyncpa [#allocation6], 0 }
   0x2   :  { %14 = vsyncpa [#allocation9], 0 }
   0x3   :  { %15 = vsyncpa [#allocation4], 0  ;;  %s727_s24 = smov [#allocation5]   ;;  %s609_s28 = scalar_lea.hbm %s906_s1, 1024 }
   0x4   :  { %s31_s25 = sshll.u32 %s727_s24, 4  ;;  %p610_p0 = scmp.ne.s32.totalorder %s906_s1, %s609_s28  ;;  %s32_s25 = int_to_ptr.vmem [resolvable:$true] %s31_s25 }
   0x5   :  { %p613_p1 = scmp.lt.u32.totalorder %s609_s28, %s906_s1 }
   0x7   :  { %p615_p2 = pnand %p613_p1, %p610_p0 }
   0x9   :  { %618 = shalt.err (!%p615_p2)
}
   0xa   :  { %s619_s10 = scalar_lea.vmem %s32_s25, 1024  ;;  %p624_p4 = scmp.lt.s32.totalorder %s32_s25, %s32_s25 }
   0xb   :  { %p620_p3 = scmp.ne.s32.totalorder %s32_s25, %s619_s10  ;;  %p625_p5 = scmp.lt.s32.totalorder %s619_s10, %s619_s10 }
   0xd   :  { %p626_p6 = por %p625_p5, %p624_p4 }
   0xf   :  { %p627_p7 = pnand %p626_p6, %p620_p3 }
  0x11   :  { %630 = shalt.err (!%p627_p7)
}
  0x12   :  { %s728_s11 = smov 64   ;;  %s729_s12 = smov 4  }
  0x13   :  { %37 = dma.hbm_to_vmem [thread:$0]  %s906_s1, 1024, %s32_s25, [#allocation6], %s728_s11, %s728_s11, %s729_s12  }
  0x14   :  { %s730_s15 = smov [#allocation2]   ;;  %s731_s17 = smov [#allocation7]  }
  0x15   :  { %s22_s16 = sshll.u32 %s730_s15, 4  ;;  %s43_s18 = sshll.u32 %s731_s17, 4  ;;  %s23_s16 = int_to_ptr.vmem [resolvable:$true] %s22_s16  ;;  %s44_s18 = int_to_ptr.vmem [resolvable:$true] %s43_s18 }
  0x16   :  { %s631_s21 = scalar_lea.hbm %s905_s0, 128 }
  0x17   :  { %p632_p8 = scmp.ne.s32.totalorder %s905_s0, %s631_s21  ;;  %p635_p9 = scmp.lt.u32.totalorder %s631_s21, %s905_s0 }
  0x19   :  { %p637_p10 = pnand %p635_p9, %p632_p8 }
  0x1b   :  { %640 = shalt.err (!%p637_p10)
}
  0x1c   :  { %s641_s1 = scalar_lea.vmem %s23_s16, 128  ;;  %p646_p12 = scmp.lt.s32.totalorder %s23_s16, %s23_s16 }
  0x1d   :  { %p642_p11 = scmp.ne.s32.totalorder %s23_s16, %s641_s1  ;;  %p647_p13 = scmp.lt.s32.totalorder %s641_s1, %s641_s1 }
  0x1f   :  { %p648_p0 = por %p647_p13, %p646_p12 }
  0x21   :  { %p649_p1 = pnand %p648_p0, %p642_p11 }
  0x23   :  { %652 = shalt.err (!%p649_p1)
}
  0x24   :  { %25 = dma.hbm_to_vmem [thread:$0]  %s905_s0, 128, %s23_s16, [#allocation3]  }
  0x25   :  { %s653_s30 = scalar_lea.hbm %s907_s2, 1024 }
  0x26   :  { %p654_p2 = scmp.ne.s32.totalorder %s907_s2, %s653_s30  ;;  %p657_p3 = scmp.lt.u32.totalorder %s653_s30, %s907_s2 }
  0x28   :  { %p659_p4 = pnand %p657_p3, %p654_p2 }
  0x2a   :  { %662 = shalt.err (!%p659_p4)
}
  0x2b   :  { %s663_s14 = scalar_lea.vmem %s44_s18, 1024  ;;  %p668_p6 = scmp.lt.s32.totalorder %s44_s18, %s44_s18 }
  0x2c   :  { %p664_p5 = scmp.ne.s32.totalorder %s44_s18, %s663_s14  ;;  %p669_p7 = scmp.lt.s32.totalorder %s663_s14, %s663_s14 }
  0x2e   :  { %p670_p8 = por %p669_p7, %p668_p6 }
  0x30   :  { %p671_p9 = pnand %p670_p8, %p664_p5 }
  0x32   :  { %674 = shalt.err (!%p671_p9)
}
  0x33   :  { %49 = dma.hbm_to_vmem [thread:$0]  %s907_s2, 1024, %s44_s18, [#allocation6], %s728_s11, %s728_s11, %s729_s12  }
  0x34   :  { %s732_s16 = smov [#allocation8]   ;;  %s675_s21 = scalar_lea.hbm %s911_s6, 256 }
  0x35   :  { %s61_s17 = sshll.u32 %s732_s16, 4  ;;  %p676_p10 = scmp.ne.s32.totalorder %s911_s6, %s675_s21  ;;  %s62_s17 = int_to_ptr.vmem [resolvable:$true] %s61_s17 }
  0x36   :  { %p679_p11 = scmp.lt.u32.totalorder %s675_s21, %s911_s6 }
  0x38   :  { %p681_p12 = pnand %p679_p11, %p676_p10 }
  0x3a   :  { %684 = shalt.err (!%p681_p12)
}
  0x3b   :  { %s685_s1 = scalar_lea.vmem %s62_s17, 256  ;;  %p690_p0 = scmp.lt.s32.totalorder %s62_s17, %s62_s17 }
  0x3c   :  { %p686_p13 = scmp.ne.s32.totalorder %s62_s17, %s685_s1  ;;  %p691_p1 = scmp.lt.s32.totalorder %s685_s1, %s685_s1 }
  0x3e   :  { %p692_p2 = por %p691_p1, %p690_p0 }
  0x40   :  { %p693_p3 = pnand %p692_p2, %p686_p13 }
  0x42   :  { %696 = shalt.err (!%p693_p3)
}
  0x43   :  { %s733_s2 = smov 128   ;;  %s734_s11 = smov 8  }
  0x44   :  { %67 = dma.hbm_to_vmem [thread:$0]  %s911_s6, 256, %s62_s17, [#allocation9], %s733_s2, %s733_s2, %s734_s11  }
  0x45   :  { %719 = dma.done.wait [#allocation3], 128  }
  0x46   :  { %720 = vsyncadd [#allocation3], 4294967168 }
  0x47   :  { %721 = dma.done.wait [#allocation6], 2048  }
  0x48   :  { %722 = vsyncadd [#allocation6], 4294965248 }
  0x49   :  { %723 = dma.done.wait [#allocation9], 256  }
  0x4a   :  { %724 = vsyncadd [#allocation9], 4294967040  ;;  %v735_v0 = vmov 0.0   ;;  %vm736_vm0 = vmmov 0   ;;  %v585_v1 = vld [vmem:[#allocation5] sm:$0xff]   ;;  %v586_v2 = vld [vmem:[#allocation5 + $0x8] sm:$0xff]  }
  0x4b   :  { %493 = vmatprep.subr.bf16.mxu0 %v735_v0  ;;  %509 = vmatprep.mubr.msk.bf16.mxu0 %vm736_vm0, %v735_v0  ;;  %v587_v3 = vld [vmem:[#allocation5 + $0x10] sm:$0xff]   ;;  %v841_v4 = vld [vmem:[#allocation7] sm:$0xff]   ;;  %v588_v5 = vld [vmem:[#allocation5 + $0x18] sm:$0xff]   ;;  %v737_v31 = vmov 1.0|1.0   ;;  %s738_s8 = smov [#allocation10]  }
  0x4c   :  { %513 = vmatprep.subr.bf16.mxu1 %v735_v0  ;;  %529 = vmatprep.mubr.msk.bf16.mxu1 %vm736_vm0, %v735_v0  ;;  %v843_v6 = vld [vmem:[#allocation7 + $0x8] sm:$0xff]   ;;  %v589_v7 = vld [vmem:[#allocation5 + $0x20] sm:$0xff]   ;;  %v591_v9 = vld [vmem:[#allocation5 + $0x30] sm:$0xff]   ;;  %s423_s9 = sshll.u32 %s738_s8, 4  ;;  %s424_s9 = int_to_ptr.vmem [resolvable:$true] %s423_s9 }
  0x4d   :  { %494 = vmatpush3.bf16.msra.mxu0 %v585_v1  ;;  %514 = vmatpush3.bf16.msra.mxu1 %v841_v4  ;;  %v590_v8 = vld [vmem:[#allocation5 + $0x28] sm:$0xff]   ;;  %v592_v10 = vld [vmem:[#allocation5 + $0x38] sm:$0xff]   ;;  %v595_v13 = vld [vmem:[#allocation7 + $0x10] sm:$0xff]   ;;  %p702_p5 = scmp.lt.s32.totalorder %s424_s9, %s424_s9 }
  0x4e   :  { %495 = vmatprep.subr.bf16.mxu0 %v735_v0  ;;  %515 = vmatprep.subr.bf16.mxu1 %v735_v0  ;;  %v115_v11 = vld [vmem:[#allocation2] sm:$0xff]  ;;  %v597_v15 = vld [vmem:[#allocation7 + $0x20] sm:$0xff]   ;;  %v598_v16 = vld [vmem:[#allocation7 + $0x28] sm:$0xff]  }
  0x4f   :  { %v116_v12 = vpack.c.bf16 %v115_v11, %v115_v11  ;;  %v596_v14 = vld [vmem:[#allocation7 + $0x18] sm:$0xff]   ;;  %v599_v17 = vld [vmem:[#allocation7 + $0x30] sm:$0xff]   ;;  %v434_v19 = vld [vmem:[%s908_s3] ss:$0 sm:$0xff] }
  0x50   :  { %v600_v18 = vld [vmem:[#allocation7 + $0x38] sm:$0xff]   ;;  %v214_v28 = vld [vmem:[%s910_s5] sm:$0xff]  ;;  %v314_v32 = vld [vmem:[#allocation8] sm:$0xff] }
  0x51   :  { %496 = vmatpush3.bf16.msra.mxu0 %v586_v2  ;;  %516 = vmatpush3.bf16.msra.mxu1 %v843_v6  ;;  %v443_v33 = vld [vmem:[%s909_s4] ss:$0 sm:$0xff]  ;;  %v315_v34 = vmul.f32 0.1, %v314_v32  ;;  %v454_v51 = vld [vmem:[%s910_s5 + $0x8] sm:$0xff]  ;;  %s697_s5 = scalar_lea.vmem %s424_s9, 128 }
  0x52   :  { %497 = vmatprep.subr.bf16.mxu0 %v735_v0  ;;  %517 = vmatprep.subr.bf16.mxu1 %v735_v0  ;;  %v410_v54 = vld [vmem:[#allocation8 + $0x8] sm:$0xff]  ;;  %p698_p4 = scmp.ne.s32.totalorder %s424_s9, %s697_s5  ;;  %p703_p6 = scmp.lt.s32.totalorder %s697_s5, %s697_s5 }
  0x53   :  { %v411_v55 = vmul.f32 0.1, %v410_v54 }
  0x54   :  { %p704_p7 = por %p703_p6, %p702_p5 }
  0x55   :  { %498 = vmatpush3.bf16.msra.mxu0 %v587_v3  ;;  %518 = vmatpush3.bf16.msra.mxu1 %v595_v13 }
  0x56   :  { %499 = vmatprep.subr.bf16.mxu0 %v735_v0  ;;  %519 = vmatprep.subr.bf16.mxu1 %v735_v0  ;;  %p705_p8 = pnand %p704_p7, %p698_p4 }
  0x59   :  { %500 = vmatpush3.bf16.msra.mxu0 %v588_v5  ;;  %520 = vmatpush3.bf16.msra.mxu1 %v596_v14 }
  0x5a   :  { %501 = vmatprep.subr.bf16.mxu0 %v735_v0  ;;  %521 = vmatprep.subr.bf16.mxu1 %v735_v0 }
  0x5d   :  { %502 = vmatpush3.bf16.msra.mxu0 %v589_v7  ;;  %522 = vmatpush3.bf16.msra.mxu1 %v597_v15 }
  0x5e   :  { %503 = vmatprep.subr.bf16.mxu0 %v735_v0  ;;  %523 = vmatprep.subr.bf16.mxu1 %v735_v0 }
  0x61   :  { %504 = vmatpush3.bf16.msra.mxu0 %v590_v8  ;;  %524 = vmatpush3.bf16.msra.mxu1 %v598_v16 }
  0x62   :  { %505 = vmatprep.subr.bf16.mxu0 %v735_v0  ;;  %525 = vmatprep.subr.bf16.mxu1 %v735_v0 }
  0x65   :  { %506 = vmatpush3.bf16.msra.mxu0 %v591_v9  ;;  %526 = vmatpush3.bf16.msra.mxu1 %v599_v17 }
  0x66   :  { %507 = vmatprep.subr.bf16.mxu0 %v735_v0  ;;  %527 = vmatprep.subr.bf16.mxu1 %v735_v0 }
  0x69   :  { %508 = vmatpush3.bf16.msra.mxu0 %v592_v10  ;;  %528 = vmatpush3.bf16.msra.mxu1 %v600_v18 }
  0x6a   :  { %533 = vmatprep.subr.bf16.mxu0 %v735_v0  ;;  %553 = vmatprep.subr.bf16.mxu1 %v735_v0 }
  0x6c   :  { %510 = vmatmul.mubr.bf16.vlgmr.msra.gmra.mrb[0].mxu0 %v116_v12 }
  0x6d   :  { %534 = vmatpush3.bf16.msra.mxu0 %v585_v1  ;;  %549 = vmatprep.mubr.msk.bf16.mxu0 %vm736_vm0, %v735_v0 }
  0x6e   :  { %535 = vmatprep.subr.bf16.mxu0 %v735_v0 }
  0x71   :  { %536 = vmatpush3.bf16.msra.mxu0 %v586_v2 }
  0x72   :  { %537 = vmatprep.subr.bf16.mxu0 %v735_v0 }
  0x75   :  { %538 = vmatpush3.bf16.msra.mxu0 %v587_v3 }
  0x76   :  { %539 = vmatprep.subr.bf16.mxu0 %v735_v0 }
  0x79   :  { %540 = vmatpush3.bf16.msra.mxu0 %v588_v5 }
  0x7a   :  { %541 = vmatprep.subr.bf16.mxu0 %v735_v0 }
  0x7d   :  { %542 = vmatpush3.bf16.msra.mxu0 %v589_v7 }
  0x7e   :  { %543 = vmatprep.subr.bf16.mxu0 %v735_v0 }
  0x81   :  { %544 = vmatpush3.bf16.msra.mxu0 %v590_v8 }
  0x82   :  { %545 = vmatprep.subr.bf16.mxu0 %v735_v0 }
  0x85   :  { %546 = vmatpush3.bf16.msra.mxu0 %v591_v9 }
  0x86   :  { %547 = vmatprep.subr.bf16.mxu0 %v735_v0 }
  0x89   :  { %548 = vmatpush3.bf16.msra.mxu0 %v592_v10 }
 0x13f   :  { %v205_v20 = vpop.f32.mrb[0].mxu0 }
 0x140   :  { %v206_v21 = vadd.f32 %v434_v19, %v205_v20  ;;  %v511_v22 = vpop.f32.mrb[1].mxu0 }
 0x141   :  { %v208_v23 = vpop.f32.mrb[2].mxu0 }
 0x142   :  { %v211_v24 = vsub.f32 0.0, %v206_v21  ;;  %v512_v25 = vpop.f32.mrb[3].mxu0 }
 0x144   :  { %v212_v26 = vmul.f32 1.442695, %v211_v24 }
 0x146   :  { %601 = vpow2.f32 %v212_v26 }
 0x150   :  { %v602_v27 = vpop.eup %601 }
 0x151   :  { %v215_v29 = vadd.f32 1.0, %v602_v27 }
 0x153   :  { %v216_v30 = vmul.f32 %v215_v29, %v214_v28 }
 0x155   :  { %vm217_vm1 = vcmp.lt.f32.partialorder %v216_v30, 1.0 }
 0x156   :  { %vm452_vm2 = vmpackc.low %vm217_vm1, %vm217_vm1 }
 0x157   :  { %530 = vmatmul.mubr.msk.bf16.vlgmr.msra.gmra.mrb[0].mxu1 %vm452_vm2, %v737_v31 }
 0x158   :  { %554 = vmatpush3.bf16.msra.mxu1 %v841_v4  ;;  %569 = vmatprep.mubr.msk.bf16.mxu1 %vm736_vm0, %v735_v0 }
 0x159   :  { %555 = vmatprep.subr.bf16.mxu1 %v735_v0 }
 0x15c   :  { %556 = vmatpush3.bf16.msra.mxu1 %v843_v6 }
 0x15d   :  { %557 = vmatprep.subr.bf16.mxu1 %v735_v0 }
 0x160   :  { %558 = vmatpush3.bf16.msra.mxu1 %v595_v13 }
 0x161   :  { %559 = vmatprep.subr.bf16.mxu1 %v735_v0 }
 0x164   :  { %560 = vmatpush3.bf16.msra.mxu1 %v596_v14 }
 0x165   :  { %561 = vmatprep.subr.bf16.mxu1 %v735_v0 }
 0x168   :  { %562 = vmatpush3.bf16.msra.mxu1 %v597_v15 }
 0x169   :  { %563 = vmatprep.subr.bf16.mxu1 %v735_v0 }
 0x16c   :  { %564 = vmatpush3.bf16.msra.mxu1 %v598_v16 }
 0x16d   :  { %565 = vmatprep.subr.bf16.mxu1 %v735_v0 }
 0x170   :  { %566 = vmatpush3.bf16.msra.mxu1 %v599_v17 }
 0x171   :  { %567 = vmatprep.subr.bf16.mxu1 %v735_v0 }
 0x174   :  { %568 = vmatpush3.bf16.msra.mxu1 %v600_v18 }
 0x22a   :  { %v308_v35 = vpop.f32.mrb[0].mxu1 }
 0x22b   :  { %v309_v36 = vadd.f32 %v443_v33, %v308_v35  ;;  %v531_v37 = vpop.f32.mrb[1].mxu1 }
 0x22c   :  { %v311_v38 = vpop.f32.mrb[2].mxu1 }
 0x22d   :  { %v316_v39 = vadd.f32 %v315_v34, %v309_v36  ;;  %v532_v40 = vpop.f32.mrb[3].mxu1 }
 0x22f   :  { %603 = vtanh.f32 %v316_v39 }
 0x239   :  { %v604_v41 = vpop.eup %603 }
 0x23a   :  { %v318_v42 = vpack.c.bf16 %v604_v41, %v604_v41 }
 0x23c   :  { %550 = vmatmul.mubr.bf16.vlgmr.msra.gmra.mrb[4].mxu0 %v318_v42 }
 0x30f   :  { %v353_v43 = vpop.f32.mrb[4].mxu0 }
 0x310   :  { %v354_v44 = vadd.f32 %v434_v19, %v353_v43  ;;  %v551_v45 = vpop.f32.mrb[5].mxu0 }
 0x311   :  { %v356_v46 = vpop.f32.mrb[6].mxu0 }
 0x312   :  { %v359_v47 = vsub.f32 0.0, %v354_v44  ;;  %v552_v48 = vpop.f32.mrb[7].mxu0 }
 0x314   :  { %v360_v49 = vmul.f32 1.442695, %v359_v47 }
 0x316   :  { %605 = vpow2.f32 %v360_v49 }
 0x320   :  { %v606_v50 = vpop.eup %605 }
 0x321   :  { %v364_v52 = vadd.f32 1.0, %v606_v50 }
 0x323   :  { %v365_v53 = vmul.f32 %v454_v51, %v364_v52 }
 0x325   :  { %vm366_vm3 = vcmp.lt.f32.partialorder %v365_v53, 1.0 }
 0x326   :  { %vm455_vm4 = vmpackc.low %vm366_vm3, %vm366_vm3 }
 0x327   :  { %570 = vmatmul.mubr.msk.bf16.vlgmr.msra.gmra.mrb[4].mxu1 %vm455_vm4, %v737_v31 }
 0x3fa   :  { %v403_v56 = vpop.f32.mrb[4].mxu1 }
 0x3fb   :  { %v404_v57 = vadd.f32 %v443_v33, %v403_v56  ;;  %v571_v58 = vpop.f32.mrb[5].mxu1 }
 0x3fc   :  { %v406_v59 = vpop.f32.mrb[6].mxu1 }
 0x3fd   :  { %v412_v60 = vadd.f32 %v411_v55, %v404_v57  ;;  %v572_v61 = vpop.f32.mrb[7].mxu1 }
 0x3ff   :  { %607 = vtanh.f32 %v412_v60 }
 0x409   :  { %v608_v62 = vpop.eup %607 }
 0x40a   :  { %v414_v63 = vpack.c.bf16 %v608_v62, %v608_v62 }
 0x40c   :  { %v415_v0 = vunpack.c.l.bf16 %v414_v63 }
 0x40e   :  { %416 = vst [vmem:[#allocation10] sm:$0xff] %v415_v0 }
 0x40f   :  { %708 = shalt.err (!%p705_p8)
}
 0x410   :  { %s709_s14 = scalar_lea.hbm %s912_s7, 128 }
 0x411   :  { %p710_p9 = scmp.ne.s32.totalorder %s912_s7, %s709_s14  ;;  %p713_p10 = scmp.lt.u32.totalorder %s709_s14, %s912_s7 }
 0x413   :  { %p715_p11 = pnand %p713_p10, %p710_p9 }
 0x415   :  { %718 = shalt.err (!%p715_p11)
}
 0x416   :  { %426 = dma.vmem_to_hbm [thread:$0]  %s424_s9, 128, %s912_s7, [#allocation4]  }
 0x417   :  { %725 = dma.done.wait [#allocation4], 128  }
 0x418   :  { %726 = vsyncadd [#allocation4], 4294967168 }
 0x419   :  { %430 = vsyncpa [#allocation3], 1 }
 0x41a   :  { %431 = vsyncpa [#allocation6], 1 }
 0x41b   :  { %432 = vsyncpa [#allocation9], 1 }
 0x41c   :  { %433 = vsyncpa [#allocation4], 1 }

</bundles_post_ra>
